<compile_context>
chip_gen: v7x
topology: tpu7x:2x2x1
jax: 0.10.0
libtpu: 0.0.40
codegen_flags: <defaults>
</compile_context>

<pallas_src>
import functools

import jax
import jax.numpy as jnp
from jax.experimental import pallas as pl
from jax.experimental.pallas import tpu as pltpu


def _fused_transition_kernel(x_ref, w_ref, b_ref, o_ref):
    """One fused step:  O = W' @ X + b.

    x_ref: (K, TM)      K = 4*C_total (window slot x channel), TM pixels on lanes
    w_ref: (Cout, K)    block-diagonal folded (BN + /4 pool + 1x1 conv) weight
    b_ref: (Cout, 1)    folded BN-shift bias
    o_ref: (Cout, TM)   lane-dense output tile
    """
    y = jnp.dot(w_ref[...], x_ref[...], preferred_element_type=jnp.float32)
    o_ref[...] = (y + b_ref[...]).astype(o_ref.dtype)


def transition_a_forward(x, params, in_channels_branch, out_channels_branch,
                         eps=1e-5):
    """Pallas-backed forward of Transition_A.  x is NCHW."""
    N, C, H, W = x.shape
    assert C == sum(in_channels_branch)
    assert H % 2 == 0 and W % 2 == 0
    Ho, Wo = H // 2, W // 2
    M = N * Ho * Wo
    n_branches = len(in_channels_branch)
    cout_total = out_channels_branch[0] + (n_branches - 1) * out_channels_branch[1]

    # ---- fold BN + avg-pool into one block-diagonal 1x1-conv weight + bias ----
    w_single = jnp.zeros((C, cout_total), jnp.float32)   # per-window-slot weight
    bias = jnp.zeros((cout_total,), jnp.float32)
    ci, co = 0, 0
    for i in range(n_branches):
        p = params["first"] if i == 0 else params["subsq"]
        cb = in_channels_branch[i]
        ob = out_channels_branch[0] if i == 0 else out_channels_branch[1]
        gamma, beta = p["bn"]["gamma"], p["bn"]["beta"]
        mean, var = p["bn"]["mean"], p["bn"]["var"]
        scale = gamma / jnp.sqrt(var + eps)               # (cb,)
        shift = beta - mean * scale                       # (cb,)
        w2d = p["w"][:, :, 0, 0]                          # (ob, cb)
        w_single = w_single.at[ci:ci + cb, co:co + ob].set(
            (scale[:, None] * w2d.T) * 0.25)
        bias = bias.at[co:co + ob].set(shift @ w2d.T)
        ci += cb
        co += ob

    K = 4 * C
    # Row p*C + c of the folded weight corresponds to window slot p, channel c.
    w_t = jnp.tile(w_single, (4, 1)).T.astype(x.dtype)    # (cout_total, K)
    bias_col = bias.reshape(cout_total, 1)                # (cout_total, 1)

    # ---- layout: NCHW -> (4*C, M) with the pixel axis on lanes ----
    xw = x.reshape(N, C, Ho, 2, Wo, 2)
    xw = jnp.transpose(xw, (3, 5, 1, 0, 2, 4))            # (2, 2, C, N, Ho, Wo)
    xt = xw.reshape(K, M)

    # Pad M up to a lane multiple, pick a large lane-dense tile.
    LANE = 128
    Mp = ((M + LANE - 1) // LANE) * LANE
    if Mp != M:
        xt = jnp.pad(xt, ((0, 0), (0, Mp - M)))
    TM = next(t for t in (512, 256, 128) if Mp % t == 0)
    if Mp // TM == 1 and TM >= 256:
        TM //= 2      # give the parallel grid >=2 steps (v7x megacore)

    flops = 2 * Mp * K * cout_total
    bytes_accessed = (xt.size * xt.dtype.itemsize
                      + w_t.size * w_t.dtype.itemsize
                      + bias_col.size * bias_col.dtype.itemsize
                      + cout_total * Mp * x.dtype.itemsize)

    out = pl.pallas_call(
        _fused_transition_kernel,
        out_shape=jax.ShapeDtypeStruct((cout_total, Mp), x.dtype),
        grid=(Mp // TM,),
        in_specs=[
            pl.BlockSpec((K, TM), lambda i: (0, i)),
            pl.BlockSpec((cout_total, K), lambda i: (0, 0)),
            pl.BlockSpec((cout_total, 1), lambda i: (0, 0)),
        ],
        out_specs=pl.BlockSpec((cout_total, TM), lambda i: (0, i)),
        compiler_params=pltpu.CompilerParams(
            dimension_semantics=("parallel",),
            vmem_limit_bytes=64 * 1024 * 1024),
        cost_estimate=pl.CostEstimate(flops=flops, transcendentals=0,
                                      bytes_accessed=bytes_accessed),
    )(xt, w_t, bias_col)

    # (Cout, M) -> (N, Cout, Ho, Wo)  (output is 8x smaller than the input)
    out = out[:, :M].reshape(cout_total, N, Ho, Wo)
    return jnp.transpose(out, (1, 0, 2, 3))


def init_transition_a_params(key, in_channels_branch, out_channels_branch):
    """Deterministic parameter init (same shapes as the PyTorch module)."""
    c0, c1 = in_channels_branch[0], in_channels_branch[1]
    o0, o1 = out_channels_branch[0], out_channels_branch[1]
    ks = jax.random.split(key, 4)

    def bn_params(k, c):
        k1, k2, k3, k4 = jax.random.split(k, 4)
        return dict(
            gamma=1.0 + 0.1 * jax.random.normal(k1, (c,), jnp.float32),
            beta=0.1 * jax.random.normal(k2, (c,), jnp.float32),
            mean=0.1 * jax.random.normal(k3, (c,), jnp.float32),
            var=jnp.abs(1.0 + 0.1 * jax.random.normal(k4, (c,), jnp.float32)),
        )

    return {
        "first": dict(
            bn=bn_params(ks[0], c0),
            w=0.1 * jax.random.normal(ks[1], (o0, c0, 1, 1), jnp.float32),
        ),
        "subsq": dict(
            bn=bn_params(ks[2], c1),
            w=0.1 * jax.random.normal(ks[3], (o1, c1, 1, 1), jnp.float32),
        ),
    }


# ----------------------------- plain-JAX reference -----------------------------
def _ref_branch(x_nchw, gamma, beta, mean, var, w_oihw, eps=1e-5):
    # Literal PyTorch order: BN -> 1x1 conv -> AvgPool2d(2,2).
    inv_std = 1.0 / jnp.sqrt(var + eps)
    xn = (x_nchw - mean[None, :, None, None]) * inv_std[None, :, None, None]
    xn = xn * gamma[None, :, None, None] + beta[None, :, None, None]
    y = jnp.einsum("nchw,oc->nohw", xn, w_oihw[:, :, 0, 0])
    N, O, H, W = y.shape
    return y.reshape(N, O, H // 2, 2, W // 2, 2).mean(axis=(3, 5))


def _ref_forward(x, params, in_channels_branch):
    outs, off = [], 0
    for i, ci in enumerate(in_channels_branch):
        xb = x[:, off:off + ci]
        off += ci
        p = params["first"] if i == 0 else params["subsq"]
        outs.append(_ref_branch(xb, p["bn"]["gamma"], p["bn"]["beta"],
                                p["bn"]["mean"], p["bn"]["var"], p["w"]))
    return jnp.concatenate(outs, axis=1)


if __name__ == "__main__":
    in_channels_branch = (8, 4, 4)     # branch 0: 8 ch, branches 1,2: 4 ch each
    out_channels_branch = (6, 4)       # branch 0 -> 6 ch, each subsequent -> 4 ch
    N, H, W = 2, 16, 16
    C = sum(in_channels_branch)

    key = jax.random.PRNGKey(0)
    kx, kp = jax.random.split(key)
    x = jax.random.normal(kx, (N, C, H, W), jnp.float32)
    params = init_transition_a_params(kp, in_channels_branch, out_channels_branch)

    fwd = jax.jit(functools.partial(transition_a_forward,
                                    in_channels_branch=in_channels_branch,
                                    out_channels_branch=out_channels_branch))
    out = fwd(x, params)
    jax.block_until_ready(out)

    expected_cout = (out_channels_branch[0]
                     + (len(in_channels_branch) - 1) * out_channels_branch[1])
    assert out.shape == (N, expected_cout, H // 2, W // 2), out.shape

    ref = _ref_forward(x, params, in_channels_branch)
    assert jnp.allclose(out, ref, rtol=1e-4, atol=1e-5), \
        float(jnp.max(jnp.abs(out - ref)))

    print("KERNEL_OK")
</pallas_src>

<mosaic_0001>
module attributes {stable_mosaic.version = 11 : i64} {
  func.func @_fused_transition_kernel(%arg0: i32, %arg1: memref<64x128xf32, #tpu.memory_space<vmem>>, %arg2: memref<14x64xf32, #tpu.memory_space<vmem>>, %arg3: memref<14x1xf32, #tpu.memory_space<vmem>>, %arg4: memref<14x128xf32, #tpu.memory_space<vmem>>) attributes {dimension_semantics = [#tpu.dimension_semantics<parallel>], iteration_bounds = array<i64: 1>, scalar_prefetch = 0 : i64, scratch_operands = 0 : i64, tpu.core_type = #tpu.core_type<tc>, window_params = [{transform_indices = @transform_0, window_bounds = array<i64: 64, 128>}, {pipeline_mode = #tpu.pipeline_mode<synchronous>, transform_indices = @transform_1, window_bounds = array<i64: 14, 64>}, {pipeline_mode = #tpu.pipeline_mode<synchronous>, transform_indices = @transform_2, window_bounds = array<i64: 14, 1>}, {transform_indices = @transform_3, window_bounds = array<i64: 14, 128>}]} {
    %c0 = arith.constant 0 : index
    %c0_0 = arith.constant 0 : index
    %0 = vector.load %arg2[%c0, %c0_0] : memref<14x64xf32, #tpu.memory_space<vmem>>, vector<14x64xf32>
    %c0_1 = arith.constant 0 : index
    %c0_2 = arith.constant 0 : index
    %1 = vector.load %arg1[%c0_1, %c0_2] : memref<64x128xf32, #tpu.memory_space<vmem>>, vector<64x128xf32>
    %cst = arith.constant dense<0.000000e+00> : vector<14x128xf32>
    %2 = tpu.matmul %0, %1, %cst {dimension_numbers = #tpu.dot_dimension_numbers<[1], [0], [0], [1], [0, 0, 1, 1], [], []>} : vector<14x64xf32>, vector<64x128xf32>, vector<14x128xf32> -> vector<14x128xf32>
    %c0_3 = arith.constant 0 : index
    %c0_4 = arith.constant 0 : index
    %3 = vector.load %arg3[%c0_3, %c0_4] : memref<14x1xf32, #tpu.memory_space<vmem>>, vector<14x1xf32>
    %4 = vector.broadcast %3 : vector<14x1xf32> to vector<14x128xf32>
    %5 = arith.addf %2, %4 : vector<14x128xf32>
    %c0_5 = arith.constant 0 : index
    %c0_6 = arith.constant 0 : index
    %6 = vector.load %arg4[%c0_5, %c0_6] : memref<14x128xf32, #tpu.memory_space<vmem>>, vector<14x128xf32>
    tpu.vector_store %arg4[%c0_5, %c0_6], %5 {strides = array<i32>} : memref<14x128xf32, #tpu.memory_space<vmem>>, vector<14x128xf32>,
    return
  }
  func.func @transform_0(%arg0: i32) -> (i32, i32) {
    %c0_i32 = arith.constant 0 : i32
    %c0_i32_0 = arith.constant 0 : i32
    return %c0_i32, %arg0 : i32, i32
  }
  func.func @transform_1(%arg0: i32) -> (i32, i32) {
    %c0_i32 = arith.constant 0 : i32
    %c0_i32_0 = arith.constant 0 : i32
    %c0_i32_1 = arith.constant 0 : i32
    return %c0_i32, %c0_i32_0 : i32, i32
  }
  func.func @transform_2(%arg0: i32) -> (i32, i32) {
    %c0_i32 = arith.constant 0 : i32
    %c0_i32_0 = arith.constant 0 : i32
    %c0_i32_1 = arith.constant 0 : i32
    return %c0_i32, %c0_i32_0 : i32, i32
  }
  func.func @transform_3(%arg0: i32) -> (i32, i32) {
    %c0_i32 = arith.constant 0 : i32
    %c0_i32_0 = arith.constant 0 : i32
    return %c0_i32, %arg0 : i32, i32
  }
}

</mosaic_0001>

<bundles_post_ra>
// kernel: tile.9
= control target key start
LH: loop header
LB: loop body
LE: loop exit
PB: predicated region body
PF: predicated region fallthrough
CT: control target
= control target key end

     0   :  { %s294_s0 = inlined_call_operand.vmem [shape: f32[4,16,14], index: 0, kind: input, shape index: {}]   ;;  %s295_s1 = inlined_call_operand.hbm [shape: f32[64,14], index: 1, kind: output, shape index: {}]  }
   0x1   :  { %v181_v0 = vld [vmem:[%s294_s0 + $0x1c] sm:$0xf]  ;;  %v182_v1 = vld [vmem:[%s294_s0 + $0x18] sm:$0xf]  ;;  %v183_v2 = vld [vmem:[%s294_s0 + $0x14] sm:$0xf] }
   0x2   :  { %39 = vst [vmem:[#allocation2 + $0x38] sm:$0xf] %v181_v0  ;;  %44 = vst [vmem:[#allocation2 + $0x30] sm:$0xf] %v182_v1  ;;  %v184_v3 = vld [vmem:[%s294_s0 + $0x10] sm:$0xf] }
   0x3   :  { %49 = vst [vmem:[#allocation2 + $0x28] sm:$0xf] %v183_v2  ;;  %v185_v4 = vld [vmem:[%s294_s0 + $0xc] sm:$0xf]  ;;  %v186_v5 = vld [vmem:[%s294_s0 + $0x8] sm:$0xf] }
   0x4   :  { %54 = vst [vmem:[#allocation2 + $0x20] sm:$0xf] %v184_v3  ;;  %59 = vst [vmem:[#allocation2 + $0x18] sm:$0xf] %v185_v4  ;;  %v187_v6 = vld [vmem:[%s294_s0 + $0x4] sm:$0xf] }
   0x5   :  { %64 = vst [vmem:[#allocation2 + $0x10] sm:$0xf] %v186_v5  ;;  %v69_v7 = vld [vmem:[%s294_s0] sm:$0xf]  ;;  %68 = vst [vmem:[#allocation2 + $0x8] sm:$0xf] %v187_v6 }
   0x6   :  { %70 = vst [vmem:[#allocation2] sm:$0xf] %v69_v7  ;;  %v175_v8 = vld [vmem:[%s294_s0 + $0x34] sm:$0xf]  ;;  %v176_v9 = vld [vmem:[%s294_s0 + $0x30] sm:$0xf] }
   0x7   :  { %9 = vst [vmem:[#allocation2 + $0x68] sm:$0xf] %v175_v8  ;;  %14 = vst [vmem:[#allocation2 + $0x60] sm:$0xf] %v176_v9  ;;  %v177_v10 = vld [vmem:[%s294_s0 + $0x2c] sm:$0xf] }
   0x8   :  { %v178_v11 = vld [vmem:[%s294_s0 + $0x28] sm:$0xf]  ;;  %v179_v12 = vld [vmem:[%s294_s0 + $0x24] sm:$0xf]  ;;  %19 = vst [vmem:[#allocation2 + $0x58] sm:$0xf] %v177_v10 }
   0x9   :  { %24 = vst [vmem:[#allocation2 + $0x50] sm:$0xf] %v178_v11  ;;  %29 = vst [vmem:[#allocation2 + $0x48] sm:$0xf] %v179_v12  ;;  %v180_v13 = vld [vmem:[%s294_s0 + $0x20] sm:$0xf] }
   0xa   :  { %34 = vst [vmem:[#allocation2 + $0x40] sm:$0xf] %v180_v13 }
   0xb   :  { %2 = vsyncpa [#allocation1], 0  ;;  %vm73_vm0 = vcmask 1047556   ;;  %s122_s0 = smov 48  ;;  %vm82_vm1 = vcmask 1045508   ;;  %s100_s5 = smov 48 }
   0xc   :  { %v112_v14 = vld [vmem:[#allocation2 + $0x2] ss:$8 sm:$0xf0]   ;;  %v90_v15 = vld [vmem:[#allocation2 + $0x3] ss:$8 sm:$0xf0]  }
   0xd   :  { %v110_v16 = vld [vmem:[#allocation2 + $0x2] ss:$8 sm:$0xf]   ;;  %v88_v17 = vld [vmem:[#allocation2 + $0x3] ss:$8 sm:$0xf]  }
   0xe   :  { %v114_v18 = vsel %vm73_vm0, %v112_v14, %v110_v16  ;;  %v92_v19 = vsel %vm73_vm0, %v90_v15, %v88_v17  ;;  %s144_s6 = smov 48  ;;  %vm75_vm2 = vcmask 130048   ;;  %s216_s7 = smov 32   ;;  %v132_v20 = vld [vmem:[#allocation2 + $0x1] ss:$8 sm:$0xf]  }
   0xf   :  { %115 = vrot.lane.b32.xlu1 %v114_v18, %s216_s7  ;;  %s217_s8 = smov 48   ;;  %v134_v21 = vld [vmem:[#allocation2 + $0x1] ss:$8 sm:$0xf0]   ;;  %s80_s9 = smov 48  ;;  %vm95_vm3 = vcmask 523648  }
  0x10   :  { %93 = vrot.lane.b32.xlu0 %v92_v19, %s217_s8  ;;  %v71_v22 = vld [vmem:[#allocation2] ss:$8 sm:$0xf]   ;;  %v136_v36 = vsel %vm73_vm0, %v134_v21, %v132_v20  ;;  %s218_s10 = smov 16   ;;  %vm117_vm4 = vcmask 392448   ;;  %s219_s11 = smov [#allocation0]  }
  0x11   :  { %v72_v23 = vld [vmem:[#allocation2] ss:$8 sm:$0xf0]   ;;  %v120_v24 = vld [vmem:[#allocation2 + $0x42] ss:$8 sm:$0xf]  }
  0x12   :  { %v123_v25 = vld [vmem:[#allocation2 + $0x42] ss:$8 sm:%s122_s0]   ;;  %v74_v26 = vsel %vm73_vm0, %v72_v23, %v71_v22  ;;  %v98_v28 = vld [vmem:[#allocation2 + $0x43] ss:$8 sm:$0xf]   ;;  %s157_s12 = sshll.u32 %s219_s11, 4  ;;  %s158_s12 = int_to_ptr.vmem [resolvable:$true] %s157_s12 }
  0x13   :  { %v125_v27 = vsel %vm82_vm1, %v123_v25, %v120_v24  ;;  %v101_v29 = vld [vmem:[#allocation2 + $0x43] ss:$8 sm:%s100_s5]   ;;  %76 = vst.msk [vmem:[#allocation0] sm:$0xff] %vm75_vm2, %v74_v26   ;;  %v142_v31 = vld [vmem:[#allocation2 + $0x41] ss:$8 sm:$0xf]   ;;  %p197_p1 = scmp.lt.s32.totalorder %s158_s12, %s158_s12 }
  0x14   :  { %v103_v30 = vsel %vm82_vm1, %v101_v29, %v98_v28  ;;  %v145_v32 = vld [vmem:[#allocation2 + $0x41] ss:$8 sm:%s144_s6]   ;;  %126 = vrot.lane.b32.xlu1 %v125_v27, %s216_s7  ;;  %v78_v33 = vld [vmem:[#allocation2 + $0x40] ss:$8 sm:$0xf]   ;;  %vm139_vm5 = vcmask 261248  }
  0x15   :  { %104 = vrot.lane.b32.xlu0 %v103_v30, %s217_s8  ;;  %v81_v34 = vld [vmem:[#allocation2 + $0x40] ss:$8 sm:%s80_s9]   ;;  %v147_v35 = vsel %vm82_vm1, %v145_v32, %v142_v31  ;;  %s192_s13 = scalar_lea.vmem %s158_s12, 256 }
  0x16   :  { %v83_v37 = vsel %vm82_vm1, %v81_v34, %v78_v33  ;;  %p193_p0 = scmp.ne.s32.totalorder %s158_s12, %s192_s13  ;;  %p198_p2 = scmp.lt.s32.totalorder %s192_s13, %s192_s13 }
  0x17   :  { %86 = vst.msk [vmem:[#allocation0 + $0x8] sm:$0x3f] %vm75_vm2, %v83_v37  }
  0x18   :  { %148 = vrot.lane.b32.xlu1 %v147_v35, %s218_s10  ;;  %p199_p3 = por %p198_p2, %p197_p1 }
  0x19   :  { %137 = vrot.lane.b32.xlu0 %v136_v36, %s218_s10 }
  0x1a   :  { %p200_p4 = pnand %p199_p3, %p193_p0 }
  0x81   :  { %v116_v38 = vpop.permute.xlu1 %115  }
  0x82   :  { %v94_v39 = vpop.permute.xlu0 %93  }
  0x83   :  { %96 = vst.msk [vmem:[#allocation0] sm:$0xff] %vm95_vm3, %v94_v39  }
  0x84   :  { %118 = vst.msk [vmem:[#allocation0] sm:$0xff] %vm117_vm4, %v116_v38  }
  0x86   :  { %v127_v40 = vpop.permute.xlu1 %126  }
  0x87   :  { %v105_v41 = vpop.permute.xlu0 %104  }
  0x88   :  { %108 = vst.msk [vmem:[#allocation0 + $0x8] sm:$0x3f] %vm95_vm3, %v105_v41  }
  0x89   :  { %130 = vst.msk [vmem:[#allocation0 + $0x8] sm:$0x3f] %vm117_vm4, %v127_v40  }
  0x8a   :  { %v149_v42 = vpop.permute.xlu1 %148  }
  0x8b   :  { %v138_v43 = vpop.permute.xlu0 %137   ;;  %152 = vst.msk [vmem:[#allocation0 + $0x8] sm:$0x3f] %vm139_vm5, %v149_v42  }
  0x8c   :  { %140 = vst.msk [vmem:[#allocation0] sm:$0xff] %vm139_vm5, %v138_v43  }
  0x8d   :  { %203 = shalt.err (!%p200_p4)
}
  0x8e   :  { %s204_s16 = scalar_lea.hbm %s295_s1, 256 }
  0x8f   :  { %p205_p5 = scmp.ne.s32.totalorder %s295_s1, %s204_s16  ;;  %p208_p6 = scmp.lt.u32.totalorder %s204_s16, %s295_s1 }
  0x91   :  { %p210_p7 = pnand %p208_p6, %p205_p5 }
  0x93   :  { %213 = shalt.err (!%p210_p7)
}
  0x94   :  { %160 = dma.vmem_to_hbm [thread:$0]  %s158_s12, 256, %s295_s1, [#allocation1]  }
  0x95   :  { %214 = dma.done.wait [#allocation1], 256  }
  0x96   :  { %215 = vsyncadd [#allocation1], 4294967040 }
  0x97   :  { %162 = vsyncpa [#allocation1], 1 }

// kernel: transition_a_forward.1
= control target key start
LH: loop header
LB: loop body
LE: loop exit
PB: predicated region body
PF: predicated region fallthrough
CT: control target
= control target key end

     0   :  { %8 = vsyncpa [#allocation3], 0  ;;  %s425_s0 = inlined_call_operand.hbm [shape: f32[64,128], index: 0, kind: input, shape index: {}]   ;;  %s426_s1 = inlined_call_operand.hbm [shape: f32[14,64], index: 1, kind: input, shape index: {}]   ;;  %s427_s2 = inlined_call_operand.hbm [shape: f32[14,1], index: 2, kind: input, shape index: {}]   ;;  %s428_s3 = inlined_call_operand.hbm [shape: f32[14,128], index: 3, kind: output, shape index: {}]  }
   0x1   :  { %9 = vsyncpa [#allocation6], 0 }
   0x2   :  { %10 = vsyncpa [#allocation4], 0  ;;  %s329_s12 = smov [#allocation5]   ;;  %s330_s14 = smov [#allocation2]  }
   0x3   :  { %s28_s13 = sshll.u32 %s329_s12, 4  ;;  %s16_s15 = sshll.u32 %s330_s14, 4  ;;  %s29_s13 = int_to_ptr.vmem [resolvable:$true] %s28_s13  ;;  %s356_s15 = int_to_ptr.vmem [resolvable:$true] %s16_s15 }
   0x4   :  { %s235_s18 = scalar_lea.hbm %s426_s1, 256 }
   0x5   :  { %p236_p0 = scmp.ne.s32.totalorder %s426_s1, %s235_s18  ;;  %p239_p1 = scmp.lt.u32.totalorder %s235_s18, %s426_s1 }
   0x7   :  { %p241_p2 = pnand %p239_p1, %p236_p0 }
   0x9   :  { %244 = shalt.err (!%p241_p2)
}
   0xa   :  { %s245_s23 = scalar_lea.vmem %s29_s13, 256  ;;  %p250_p4 = scmp.lt.s32.totalorder %s29_s13, %s29_s13 }
   0xb   :  { %p246_p3 = scmp.ne.s32.totalorder %s29_s13, %s245_s23  ;;  %p251_p5 = scmp.lt.s32.totalorder %s245_s23, %s245_s23 }
   0xd   :  { %p252_p6 = por %p251_p5, %p250_p4 }
   0xf   :  { %p253_p7 = pnand %p252_p6, %p246_p3 }
  0x11   :  { %256 = shalt.err (!%p253_p7)
}
  0x12   :  { %s331_s24 = smov 128   ;;  %s332_s25 = smov 8  }
  0x13   :  { %34 = dma.hbm_to_vmem [thread:$0]  %s426_s1, 256, %s29_s13, [#allocation6], %s331_s24, %s331_s24, %s332_s25  }
  0x14   :  { %s257_s30 = scalar_lea.hbm %s425_s0, 1024 }
  0x15   :  { %p258_p8 = scmp.ne.s32.totalorder %s425_s0, %s257_s30  ;;  %p261_p9 = scmp.lt.u32.totalorder %s257_s30, %s425_s0 }
  0x17   :  { %p263_p10 = pnand %p261_p9, %p258_p8 }
  0x19   :  { %266 = shalt.err (!%p263_p10)
}
  0x1a   :  { %s267_s8 = scalar_lea.vmem %s356_s15, 1024  ;;  %p272_p12 = scmp.lt.s32.totalorder %s356_s15, %s356_s15 }
  0x1b   :  { %p268_p11 = scmp.ne.s32.totalorder %s356_s15, %s267_s8  ;;  %p273_p13 = scmp.lt.s32.totalorder %s267_s8, %s267_s8 }
  0x1d   :  { %p274_p0 = por %p273_p13, %p272_p12 }
  0x1f   :  { %p275_p1 = pnand %p274_p0, %p268_p11 }
  0x21   :  { %278 = shalt.err (!%p275_p1)
}
  0x22   :  { %22 = dma.hbm_to_vmem [thread:$0]  %s425_s0, 1024, %s356_s15, [#allocation3], %s331_s24, %s331_s24, %s332_s25  }
  0x23   :  { %s333_s10 = smov [#allocation7]   ;;  %s279_s14 = scalar_lea.hbm %s427_s2, 256 }
  0x24   :  { %s40_s11 = sshll.u32 %s333_s10, 4  ;;  %p280_p2 = scmp.ne.s32.totalorder %s427_s2, %s279_s14  ;;  %s41_s11 = int_to_ptr.vmem [resolvable:$true] %s40_s11 }
  0x25   :  { %p283_p3 = scmp.lt.u32.totalorder %s279_s14, %s427_s2 }
  0x27   :  { %p285_p4 = pnand %p283_p3, %p280_p2 }
  0x29   :  { %288 = shalt.err (!%p285_p4)
}
  0x2a   :  { %s289_s20 = scalar_lea.vmem %s41_s11, 256  ;;  %p294_p6 = scmp.lt.s32.totalorder %s41_s11, %s41_s11 }
  0x2b   :  { %p290_p5 = scmp.ne.s32.totalorder %s41_s11, %s289_s20  ;;  %p295_p7 = scmp.lt.s32.totalorder %s289_s20, %s289_s20 }
  0x2d   :  { %p296_p8 = por %p295_p7, %p294_p6 }
  0x2f   :  { %p297_p9 = pnand %p296_p8, %p290_p5 }
  0x31   :  { %300 = shalt.err (!%p297_p9)
}
  0x32   :  { %46 = dma.hbm_to_vmem [thread:$0]  %s427_s2, 256, %s41_s11, [#allocation6], %s331_s24, %s331_s24, %s332_s25  }
  0x33   :  { %323 = dma.done.wait [#allocation3], 1024  }
  0x34   :  { %324 = vsyncadd [#allocation3], 4294966272 }
  0x35   :  { %325 = dma.done.wait [#allocation6], 512  }
  0x36   :  { %326 = vsyncadd [#allocation6], 4294966784  ;;  %v334_v0 = vmov 0   ;;  %v58_v1 = vld [vmem:[#allocation2] sm:$0xff]  ;;  %v59_v2 = vld [vmem:[#allocation2 + $0x8] sm:$0xff]  ;;  %vm78_vm0 = vcmask 523264  }
  0x37   :  { %234 = vset.pattern.permute.xlu0 %v334_v0  ;;  %v60_v3 = vld [vmem:[#allocation2 + $0x10] sm:$0xff]  ;;  %v211_v4 = vpack.c.bf16 %v59_v2, %v58_v1  ;;  %v61_v5 = vld [vmem:[#allocation2 + $0x18] sm:$0xff]  ;;  %v62_v7 = vld [vmem:[#allocation2 + $0x20] sm:$0xff]  ;;  %s335_s2 = smov [#allocation8]  }
  0x38   :  { %v215_v6 = vpack.c.bf16 %v61_v5, %v60_v3  ;;  %v63_v8 = vld [vmem:[#allocation2 + $0x28] sm:$0xff]  ;;  %v56_v9 = vld [vmem:[#allocation5] sm:$0xff]  ;;  %v66_v10 = vld [vmem:[#allocation7] sm:$0xff]  ;;  %s167_s21 = sshll.u32 %s335_s2, 4  ;;  %s168_s21 = int_to_ptr.vmem [resolvable:$true] %s167_s21 }
  0x39   :  { %212 = vmatprep.subr.bf16.mxu0 %v211_v4  ;;  %208 = vmatprep.mubr.msk.f32.mxu0 %vm78_vm0, %v56_v9  ;;  %v219_v11 = vpack.c.bf16 %v63_v8, %v62_v7  ;;  %v67_v12 = vld [vmem:[#allocation7 + $0x8] sm:$0x3f]  ;;  %v64_v13 = vld [vmem:[#allocation2 + $0x30] sm:$0xff]  ;;  %v57_v16 = vld [vmem:[#allocation5 + $0x8] sm:$0x3f]  ;;  %s301_s22 = scalar_lea.vmem %s168_s21, 256  ;;  %p306_p11 = scmp.lt.s32.totalorder %s168_s21, %s168_s21 }
  0x3a   :  { %214 = vmatpush3.bf16.msra.mxu0 %v211_v4  ;;  %70 = vperm.xlu0 %234, %v66_v10   ;;  %v65_v14 = vld [vmem:[#allocation2 + $0x38] sm:$0xff]  ;;  %p302_p10 = scmp.ne.s32.totalorder %s168_s21, %s301_s22  ;;  %p307_p12 = scmp.lt.s32.totalorder %s301_s22, %s301_s22 }
  0x3b   :  { %216 = vmatprep.subr.bf16.mxu0 %v215_v6  ;;  %v223_v15 = vpack.c.bf16 %v65_v14, %v64_v13 }
  0x3c   :  { %p308_p13 = por %p307_p12, %p306_p11 }
  0x3e   :  { %218 = vmatpush3.bf16.msra.mxu0 %v215_v6  ;;  %75 = vperm.xlu0 %234, %v67_v12   ;;  %p309_p0 = pnand %p308_p13, %p302_p10 }
  0x3f   :  { %220 = vmatprep.subr.bf16.mxu0 %v219_v11 }
  0x42   :  { %222 = vmatpush3.bf16.msra.mxu0 %v219_v11 }
  0x43   :  { %224 = vmatprep.subr.bf16.mxu0 %v223_v15 }
  0x46   :  { %226 = vmatpush3.bf16.msra.mxu0 %v223_v15 }
  0x49   :  { %209 = vmatmul.mubr.msk.f32.vlgmr.msra.gmra.mrb[0].mxu0 %vm78_vm0, %v57_v16 }
  0xb9   :  { %v71_v17 = vpop.permute.xlu0 %70 }
  0xbd   :  { %v76_v18 = vpop.permute.xlu0 %75 }
 0x11c   :  { %v210_v19 = vpop.f32.mrb[0].mxu0 }
 0x11d   :  { %v157_v20 = vadd.f32 %v210_v19, %v76_v18  ;;  %v151_v21 = vpop.f32.mrb[1].mxu0 }
 0x11e   :  { %v152_v22 = vadd.f32 %v151_v21, %v71_v17 }
 0x11f   :  { %161 = vst [vmem:[#allocation8 + $0x8] sm:$0x3f] %v157_v20 }
 0x120   :  { %160 = vst [vmem:[#allocation8] sm:$0xff] %v152_v22 }
 0x121   :  { %312 = shalt.err (!%p309_p0)
}
 0x122   :  { %s313_s27 = scalar_lea.hbm %s428_s3, 256 }
 0x123   :  { %p314_p1 = scmp.ne.s32.totalorder %s428_s3, %s313_s27  ;;  %p317_p2 = scmp.lt.u32.totalorder %s313_s27, %s428_s3 }
 0x125   :  { %p319_p3 = pnand %p317_p2, %p314_p1 }
 0x127   :  { %322 = shalt.err (!%p319_p3)
}
 0x128   :  { %173 = dma.vmem_to_hbm [thread:$0]  %s168_s21, 256, %s428_s3, [#allocation4], %s331_s24, %s331_s24, %s332_s25  }
 0x129   :  { %327 = dma.done.wait [#allocation4], 256  }
 0x12a   :  { %328 = vsyncadd [#allocation4], 4294967040 }
 0x12b   :  { %177 = vsyncpa [#allocation3], 1 }
 0x12c   :  { %178 = vsyncpa [#allocation6], 1 }
 0x12d   :  { %179 = vsyncpa [#allocation4], 1 }

</bundles_post_ra>
